<compile_context>
chip_gen: v7x
topology: tpu7x:2x2x1
jax: 0.10.0
libtpu: 0.0.40
codegen_flags: <defaults>
</compile_context>

<pallas_src>
import jax
import jax.numpy as jnp
from jax.experimental import pallas as pl
from jax.experimental.pallas import tpu as pltpu


# ------------------------- in-kernel epilogue -------------------------

def _bn_swish(y, gamma, beta_bn, sbeta):
    """Training-mode BatchNorm1d (biased batch var, eps=1e-5), gamma folded
    into the rsqrt scale, followed by Swish(beta).  All f32 (v5e's VPU/EUP
    have no bf16 path; f32 epilogue is the safe default on every chip)."""
    inv_b = 1.0 / y.shape[0]
    mean = jnp.sum(y, axis=0, keepdims=True) * inv_b
    yc = y - mean                                           # two-pass: no cancellation
    var = jnp.sum(yc * yc, axis=0, keepdims=True) * inv_b
    scale = gamma * jax.lax.rsqrt(var + 1e-5)
    y_bn = yc * scale + beta_bn
    return y_bn * jax.nn.sigmoid(sbeta * y_bn)


# ------------------------- Pallas kernels -------------------------

def _resblock_kernel_ds(x_ref, wcat_ref, bds_ref, gamma_ref, betabn_ref,
                        sbeta_ref, o_ref, acc_ref):
    """Downsample path: one fused MXU matmul per (feature, K) step producing
    [ y_tile | res_tile ]; epilogue on the last K step."""
    k = pl.program_id(1)

    @pl.when(k == 0)
    def _():
        acc_ref[...] = jnp.zeros_like(acc_ref)

    # bf16 x bf16 -> f32 accumulate on the MXU.
    acc_ref[...] += jnp.dot(x_ref[...], wcat_ref[...],
                            preferred_element_type=jnp.float32)

    @pl.when(k == pl.num_programs(1) - 1)
    def _():
        tn = o_ref.shape[1]
        yz = acc_ref[...]
        y = yz[:, :tn]                    # fc path (b_fc cancelled exactly by BN mean)
        res = yz[:, tn:] + bds_ref[...]   # downsample residual
        o_ref[...] = _bn_swish(y, gamma_ref[...], betabn_ref[...],
                               sbeta_ref[0, 0]) + res


def _resblock_kernel_identity(x_ref, w_ref, xres_ref, gamma_ref, betabn_ref,
                              sbeta_ref, o_ref, acc_ref):
    """Identity-residual path (in_dim == out_dim): no eye() matmul; the f32 x
    feature tile is added directly in the epilogue."""
    k = pl.program_id(1)

    @pl.when(k == 0)
    def _():
        acc_ref[...] = jnp.zeros_like(acc_ref)

    acc_ref[...] += jnp.dot(x_ref[...], w_ref[...],
                            preferred_element_type=jnp.float32)

    @pl.when(k == pl.num_programs(1) - 1)
    def _():
        y = acc_ref[...]
        o_ref[...] = _bn_swish(y, gamma_ref[...], betabn_ref[...],
                               sbeta_ref[0, 0]) + xres_ref[...]


# ------------------------- tiling helpers -------------------------

def _pick_feature_tile(out_dim):
    """Largest multiple-of-128 divisor of out_dim (<=512), preferring a split
    into >=2 feature blocks (so v7x's two TensorCores both get work).  Falls
    back to a single full (possibly lane-masked) block for small/odd dims."""
    if out_dim % 128 != 0:
        return out_dim
    caps = [min(512, out_dim // 2), 512] if out_dim >= 256 else [512]
    for cap in caps:
        best = 0
        t = 128
        while t <= min(out_dim, cap):
            if out_dim % t == 0:
                best = t
            t += 128
        if best:
            return best
    return out_dim


def _pick_k_tile(in_dim):
    """Largest multiple-of-128 divisor of in_dim (<=512).  K-tiling keeps the
    double-buffered weight block's VMEM footprint independent of in_dim."""
    if in_dim % 128 != 0:
        return in_dim
    best = in_dim
    t = 128
    while t <= min(in_dim, 512):
        if in_dim % t == 0:
            best = t
        t += 128
    return best


# ------------------------- one-time parameter prep (hoisted out of forward) -------------------------

def resblock_prepare(w_fc_t, b_fc, w_ds_t, b_ds, gamma, beta_bn, swish_beta):
    """Tiling decisions, bf16 weight cast, and per-feature-tile interleave of
    [W_fc | W_ds].  Done once per parameter set, not per forward call.

    b_fc is intentionally dropped: training-mode BN subtracts the batch mean,
    which contains b_fc exactly, so adding it pre-BN is a no-op."""
    del b_fc
    in_dim, out_dim = w_fc_t.shape
    has_ds = w_ds_t is not None

    TN = _pick_feature_tile(out_dim)
    n_blocks = out_dim // TN
    TK = _pick_k_tile(in_dim)
    k_blocks = in_dim // TK

    if has_ds:
        # Interleave fc / ds weight columns per feature tile so each grid step
        # pushes x through the MXU once: [ y_tile | res_tile ].
        w = jnp.concatenate(
            [jnp.asarray(w_fc_t, jnp.float32).reshape(in_dim, n_blocks, TN),
             jnp.asarray(w_ds_t, jnp.float32).reshape(in_dim, n_blocks, TN)],
            axis=-1,
        ).reshape(in_dim, 2 * out_dim).astype(jnp.bfloat16)
        b_ds = jnp.asarray(b_ds, jnp.float32).reshape(1, out_dim)
    else:
        # Identity residual: skip the eye() matmul entirely.
        w = jnp.asarray(w_fc_t, jnp.bfloat16)
        b_ds = None

    return dict(
        w=w, b_ds=b_ds,
        gamma=jnp.asarray(gamma, jnp.float32).reshape(1, out_dim),
        beta_bn=jnp.asarray(beta_bn, jnp.float32).reshape(1, out_dim),
        swish_beta=jnp.asarray(swish_beta, jnp.float32).reshape(1, 1),
        in_dim=in_dim, out_dim=out_dim, has_ds=has_ds,
        TN=TN, TK=TK, n_blocks=n_blocks, k_blocks=k_blocks,
    )


# ------------------------- forward wrapper -------------------------

def resblock_pallas(x, prep):
    B, in_dim = x.shape
    assert in_dim == prep["in_dim"]
    out_dim, TN, TK = prep["out_dim"], prep["TN"], prep["TK"]
    n_blocks, k_blocks = prep["n_blocks"], prep["k_blocks"]
    has_ds = prep["has_ds"]

    x_bf16 = x.astype(jnp.bfloat16)       # bf16 MXU inputs; f32 accumulate/epilogue
    acc_cols = 2 * TN if has_ds else TN

    cost = pl.CostEstimate(
        flops=int(2 * B * in_dim * (2 * out_dim if has_ds else out_dim)),
        transcendentals=int(B * out_dim),
        bytes_accessed=int(B * in_dim * 2 + prep["w"].size * 2
                           + B * out_dim * 4 + 4 * out_dim * 4),
    )

    # Double-buffered bf16 inputs + f32 output + f32 accumulator (+ f32 x
    # residual tile for the identity case), with generous headroom; clamped
    # inside v7x's 64 MiB physical VMEM.
    vmem_bytes = (2 * B * TK * 2 + 2 * TK * acc_cols * 2 + 2 * B * TN * 4
                  + B * acc_cols * 4 + 8 * TN * 4)
    if not has_ds:
        vmem_bytes += 2 * B * TN * 4
    vmem_limit = int(min(max(2 * vmem_bytes + (4 << 20), 32 << 20), 60 << 20))

    def tile_spec():
        return pl.BlockSpec((1, TN), lambda j, k: (0, j))

    if has_ds:
        kernel = _resblock_kernel_ds
        in_specs = [
            pl.BlockSpec((B, TK), lambda j, k: (0, k)),         # x (bf16, K-tiled)
            pl.BlockSpec((TK, 2 * TN), lambda j, k: (k, j)),    # [Wfc|Wds] (bf16)
            tile_spec(),                                        # b_ds
            tile_spec(),                                        # gamma
            tile_spec(),                                        # beta (BN shift)
            pl.BlockSpec(memory_space=pltpu.MemorySpace.SMEM),  # swish beta scalar
        ]
        operands = (x_bf16, prep["w"], prep["b_ds"], prep["gamma"],
                    prep["beta_bn"], prep["swish_beta"])
    else:
        kernel = _resblock_kernel_identity
        in_specs = [
            pl.BlockSpec((B, TK), lambda j, k: (0, k)),         # x (bf16, K-tiled)
            pl.BlockSpec((TK, TN), lambda j, k: (k, j)),        # W_fc (bf16)
            pl.BlockSpec((B, TN), lambda j, k: (0, j)),         # x residual (f32)
            tile_spec(),                                        # gamma
            tile_spec(),                                        # beta (BN shift)
            pl.BlockSpec(memory_space=pltpu.MemorySpace.SMEM),  # swish beta scalar
        ]
        operands = (x_bf16, prep["w"], x, prep["gamma"],
                    prep["beta_bn"], prep["swish_beta"])

    return pl.pallas_call(
        kernel,
        out_shape=jax.ShapeDtypeStruct((B, out_dim), jnp.float32),
        grid=(n_blocks, k_blocks),
        in_specs=in_specs,
        out_specs=pl.BlockSpec((B, TN), lambda j, k: (0, j)),
        scratch_shapes=[pltpu.VMEM((B, acc_cols), jnp.float32)],
        compiler_params=pltpu.CompilerParams(
            dimension_semantics=("parallel", "arbitrary"),
            vmem_limit_bytes=vmem_limit),
        cost_estimate=cost,
    )(*operands)


# ------------------------- parameter setup (glue, plain JAX) -------------------------
# TODO(synk): spectral_norm power iteration & kaiming init are parameter setup,
# kept in plain JAX outside the kernel (matches the PyTorch module's __init__).

def l2_normalize(v, eps=1e-12):
    return v / (jnp.linalg.norm(v) + eps)


def spectral_normalize(w, u0, n_power_iterations=3):
    """PyTorch-style spectral norm. w: (out_dim, in_dim), u0: (out_dim,)."""
    u = l2_normalize(u0)
    v = None
    for _ in range(n_power_iterations):
        v = l2_normalize(w.T @ u)
        u = l2_normalize(w @ v)
    sigma = u @ (w @ v)
    return w / sigma


def kaiming_normal_leaky_relu(key, out_dim, in_dim):
    gain = jnp.sqrt(2.0 / (1.0 + 0.01 ** 2))   # leaky_relu, slope 0.01
    std = gain / jnp.sqrt(in_dim)
    return std * jax.random.normal(key, (out_dim, in_dim), dtype=jnp.float32)


# ------------------------- reference (plain JAX, per the PyTorch spec) -------------------------

def resblock_ref(x, w_fc_t, b_fc, w_ds_t, b_ds, gamma, beta_bn, swish_beta):
    y = x @ w_fc_t + b_fc
    mean = jnp.mean(y, axis=0, keepdims=True)
    var = jnp.mean((y - mean) ** 2, axis=0, keepdims=True)
    y_bn = (y - mean) / jnp.sqrt(var + 1e-5) * gamma + beta_bn
    out = y_bn * jax.nn.sigmoid(swish_beta * y_bn)
    res = x if w_ds_t is None else x @ w_ds_t + b_ds
    return out + res


# ------------------------- main -------------------------

if __name__ == "__main__":
    key = jax.random.PRNGKey(0)

    def make_linear_sn(kw, ku, kb, out_dim, in_dim):
        w = kaiming_normal_leaky_relu(kw, out_dim, in_dim)
        u = jax.random.normal(ku, (out_dim,), dtype=jnp.float32)
        w_sn = spectral_normalize(w, u, n_power_iterations=3)
        bound = 1.0 / jnp.sqrt(in_dim)
        b = jax.random.uniform(kb, (1, out_dim), minval=-bound, maxval=bound)
        return w_sn, b

    # --- case 1: in_dim != out_dim (downsample path active) ---
    B, in_dim, out_dim = 8, 32, 16
    ks = jax.random.split(key, 8)
    x = jax.random.normal(ks[0], (B, in_dim), dtype=jnp.float32)
    w_fc, b_fc = make_linear_sn(ks[1], ks[2], ks[3], out_dim, in_dim)
    w_ds, b_ds = make_linear_sn(ks[4], ks[5], ks[6], out_dim, in_dim)
    gamma = jnp.ones((1, out_dim), jnp.float32)     # BatchNorm1d fresh init
    beta_bn = jnp.zeros((1, out_dim), jnp.float32)
    swish_beta = jnp.ones((1, 1), jnp.float32)      # trainable Swish beta, init 1.0

    prep = resblock_prepare(w_fc.T, b_fc, w_ds.T, b_ds, gamma, beta_bn, swish_beta)
    out = jax.block_until_ready(resblock_pallas(x, prep))
    ref = resblock_ref(x, w_fc.T, b_fc, w_ds.T, b_ds, gamma, beta_bn, swish_beta)
    # Tolerance covers bf16 MXU inputs + the (exact) b_fc cancellation rewrite.
    assert jnp.allclose(out, ref, atol=5e-2, rtol=5e-2), "downsample case mismatch"

    # --- case 2: in_dim == out_dim (identity residual, no eye() matmul) ---
    dim = 16
    ks2 = jax.random.split(ks[7], 5)
    x2 = jax.random.normal(ks2[0], (B, dim), dtype=jnp.float32)
    w2, b2 = make_linear_sn(ks2[1], ks2[2], ks2[3], dim, dim)
    gamma2 = jnp.ones((1, dim), jnp.float32)
    beta2 = jnp.zeros((1, dim), jnp.float32)

    prep2 = resblock_prepare(w2.T, b2, None, None, gamma2, beta2, swish_beta)
    out2 = jax.block_until_ready(resblock_pallas(x2, prep2))
    ref2 = resblock_ref(x2, w2.T, b2, None, None, gamma2, beta2, swish_beta)
    assert jnp.allclose(out2, ref2, atol=5e-2, rtol=5e-2), "identity case mismatch"

    print("KERNEL_OK")
</pallas_src>

<mosaic_0001>
module attributes {stable_mosaic.version = 11 : i64} {
  func.func @_resblock_kernel_ds(%arg0: i32, %arg1: i32, %arg2: memref<8x32xbf16, #tpu.memory_space<vmem>>, %arg3: memref<32x32xbf16, #tpu.memory_space<vmem>>, %arg4: memref<1x16xf32, #tpu.memory_space<vmem>>, %arg5: memref<1x16xf32, #tpu.memory_space<vmem>>, %arg6: memref<1x16xf32, #tpu.memory_space<vmem>>, %arg7: memref<1x1xf32, #tpu.memory_space<smem>>, %arg8: memref<8x16xf32, #tpu.memory_space<vmem>>, %arg9: memref<8x32xf32, #tpu.memory_space<vmem>>) attributes {dimension_semantics = [#tpu.dimension_semantics<parallel>, #tpu.dimension_semantics<arbitrary>], iteration_bounds = array<i64: 1, 1>, scalar_prefetch = 0 : i64, scratch_operands = 1 : i64, tpu.core_type = #tpu.core_type<tc>, window_params = [{transform_indices = @transform_0, window_bounds = array<i64: 8, 32>}, {transform_indices = @transform_1, window_bounds = array<i64: 32, 32>}, {transform_indices = @transform_2, window_bounds = array<i64: 1, 16>}, {transform_indices = @transform_3, window_bounds = array<i64: 1, 16>}, {transform_indices = @transform_4, window_bounds = array<i64: 1, 16>}, {transform_indices = @transform_5, window_bounds = array<i64: 1, 1>}, {transform_indices = @transform_6, window_bounds = array<i64: 8, 16>}]} {
    %c0_i32 = arith.constant 0 : i32
    %0 = arith.cmpi eq, %arg1, %c0_i32 : i32
    %1 = arith.extui %0 : i1 to i32
    %c0_i32_0 = arith.constant 0 : i32
    %2 = arith.cmpi ne, %1, %c0_i32_0 : i32
    scf.if %2 {
      %cst_10 = arith.constant 0.000000e+00 : f32
      %12 = vector.broadcast %cst_10 : f32 to vector<8x32xf32>
      %c0_11 = arith.constant 0 : index
      %c0_12 = arith.constant 0 : index
      %13 = vector.load %arg9[%c0_11, %c0_12] : memref<8x32xf32, #tpu.memory_space<vmem>>, vector<8x32xf32>
      tpu.vector_store %arg9[%c0_11, %c0_12], %12 {strides = array<i32>} : memref<8x32xf32, #tpu.memory_space<vmem>>, vector<8x32xf32>,
    } else {
    }
    %c0 = arith.constant 0 : index
    %c0_1 = arith.constant 0 : index
    %3 = vector.load %arg9[%c0, %c0_1] : memref<8x32xf32, #tpu.memory_space<vmem>>, vector<8x32xf32>
    %c0_2 = arith.constant 0 : index
    %c0_3 = arith.constant 0 : index
    %4 = vector.load %arg2[%c0_2, %c0_3] : memref<8x32xbf16, #tpu.memory_space<vmem>>, vector<8x32xbf16>
    %c0_4 = arith.constant 0 : index
    %c0_5 = arith.constant 0 : index
    %5 = vector.load %arg3[%c0_4, %c0_5] : memref<32x32xbf16, #tpu.memory_space<vmem>>, vector<32x32xbf16>
    %cst = arith.constant dense<0.000000e+00> : vector<8x32xf32>
    %6 = tpu.matmul %4, %5, %cst {dimension_numbers = #tpu.dot_dimension_numbers<[1], [0], [0], [1], [0, 0, 1, 1], [], []>} : vector<8x32xbf16>, vector<32x32xbf16>, vector<8x32xf32> -> vector<8x32xf32>
    %7 = arith.addf %3, %6 : vector<8x32xf32>
    %c0_6 = arith.constant 0 : index
    %c0_7 = arith.constant 0 : index
    %8 = vector.load %arg9[%c0_6, %c0_7] : memref<8x32xf32, #tpu.memory_space<vmem>>, vector<8x32xf32>
    tpu.vector_store %arg9[%c0_6, %c0_7], %7 {strides = array<i32>} : memref<8x32xf32, #tpu.memory_space<vmem>>, vector<8x32xf32>,
    %c0_i32_8 = arith.constant 0 : i32
    %9 = arith.cmpi eq, %arg1, %c0_i32_8 : i32
    %10 = arith.extui %9 : i1 to i32
    %c0_i32_9 = arith.constant 0 : i32
    %11 = arith.cmpi ne, %10, %c0_i32_9 : i32
    scf.if %11 {
      %c0_10 = arith.constant 0 : index
      %c0_11 = arith.constant 0 : index
      %12 = vector.load %arg9[%c0_10, %c0_11] : memref<8x32xf32, #tpu.memory_space<vmem>>, vector<8x32xf32>
      %13 = vector.extract_strided_slice %12 {offsets = [0, 0], sizes = [8, 16], strides = [1, 1]} : vector<8x32xf32> to vector<8x16xf32>
      %14 = vector.extract_strided_slice %12 {offsets = [0, 16], sizes = [8, 16], strides = [1, 1]} : vector<8x32xf32> to vector<8x16xf32>
      %c0_12 = arith.constant 0 : index
      %c0_13 = arith.constant 0 : index
      %15 = vector.load %arg4[%c0_12, %c0_13] : memref<1x16xf32, #tpu.memory_space<vmem>>, vector<1x16xf32>
      %16 = vector.broadcast %15 : vector<1x16xf32> to vector<8x16xf32>
      %17 = arith.addf %14, %16 : vector<8x16xf32>
      %c0_14 = arith.constant 0 : index
      %c0_15 = arith.constant 0 : index
      %18 = vector.load %arg5[%c0_14, %c0_15] : memref<1x16xf32, #tpu.memory_space<vmem>>, vector<1x16xf32>
      %c0_16 = arith.constant 0 : index
      %c0_17 = arith.constant 0 : index
      %19 = vector.load %arg6[%c0_16, %c0_17] : memref<1x16xf32, #tpu.memory_space<vmem>>, vector<1x16xf32>
      %c0_18 = arith.constant 0 : index
      %c0_19 = arith.constant 0 : index
      %20 = memref.load %arg7[%c0_18, %c0_19] : memref<1x1xf32, #tpu.memory_space<smem>>
      %cst_20 = arith.constant dense<0.000000e+00> : vector<16xf32>
      %21 = vector.multi_reduction <add>, %13, %cst_20 [0] : vector<8x16xf32> to vector<16xf32>
      %22 = vector.shape_cast %21 : vector<16xf32> to vector<1x16xf32>
      %cst_21 = arith.constant 1.250000e-01 : f32
      %23 = vector.broadcast %cst_21 : f32 to vector<1x16xf32>
      %24 = arith.mulf %22, %23 : vector<1x16xf32>
      %25 = vector.broadcast %24 : vector<1x16xf32> to vector<8x16xf32>
      %26 = arith.subf %13, %25 : vector<8x16xf32>
      %27 = arith.mulf %26, %26 : vector<8x16xf32>
      %cst_22 = arith.constant dense<0.000000e+00> : vector<16xf32>
      %28 = vector.multi_reduction <add>, %27, %cst_22 [0] : vector<8x16xf32> to vector<16xf32>
      %29 = vector.shape_cast %28 : vector<16xf32> to vector<1x16xf32>
      %cst_23 = arith.constant 1.250000e-01 : f32
      %30 = vector.broadcast %cst_23 : f32 to vector<1x16xf32>
      %31 = arith.mulf %29, %30 : vector<1x16xf32>
      %cst_24 = arith.constant 9.99999974E-6 : f32
      %32 = vector.broadcast %cst_24 : f32 to vector<1x16xf32>
      %33 = arith.addf %31, %32 : vector<1x16xf32>
      %34 = math.rsqrt %33 : vector<1x16xf32>
      %35 = arith.mulf %18, %34 : vector<1x16xf32>
      %36 = vector.broadcast %35 : vector<1x16xf32> to vector<8x16xf32>
      %37 = arith.mulf %26, %36 : vector<8x16xf32>
      %38 = vector.broadcast %19 : vector<1x16xf32> to vector<8x16xf32>
      %39 = arith.addf %37, %38 : vector<8x16xf32>
      %40 = vector.broadcast %20 : f32 to vector<8x16xf32>
      %41 = arith.mulf %40, %39 : vector<8x16xf32>
      %42 = arith.negf %41 : vector<8x16xf32>
      %43 = math.exp %42 : vector<8x16xf32>
      %cst_25 = arith.constant 1.000000e+00 : f32
      %44 = vector.broadcast %cst_25 : f32 to vector<8x16xf32>
      %45 = arith.addf %44, %43 : vector<8x16xf32>
      %46 = arith.divf %44, %45 : vector<8x16xf32>
      %47 = arith.mulf %39, %46 : vector<8x16xf32>
      %48 = arith.addf %47, %17 : vector<8x16xf32>
      %c0_26 = arith.constant 0 : index
      %c0_27 = arith.constant 0 : index
      %49 = vector.load %arg8[%c0_26, %c0_27] : memref<8x16xf32, #tpu.memory_space<vmem>>, vector<8x16xf32>
      tpu.vector_store %arg8[%c0_26, %c0_27], %48 {strides = array<i32>} : memref<8x16xf32, #tpu.memory_space<vmem>>, vector<8x16xf32>,
    } else {
    }
    return
  }
  func.func @transform_0(%arg0: i32, %arg1: i32) -> (i32, i32) {
    %c0_i32 = arith.constant 0 : i32
    %c0_i32_0 = arith.constant 0 : i32
    return %c0_i32, %arg1 : i32, i32
  }
  func.func @transform_1(%arg0: i32, %arg1: i32) -> (i32, i32) {
    %c0_i32 = arith.constant 0 : i32
    return %arg1, %arg0 : i32, i32
  }
  func.func @transform_2(%arg0: i32, %arg1: i32) -> (i32, i32) {
    %c0_i32 = arith.constant 0 : i32
    %c0_i32_0 = arith.constant 0 : i32
    return %c0_i32, %arg0 : i32, i32
  }
  func.func @transform_3(%arg0: i32, %arg1: i32) -> (i32, i32) {
    %c0_i32 = arith.constant 0 : i32
    %c0_i32_0 = arith.constant 0 : i32
    return %c0_i32, %arg0 : i32, i32
  }
  func.func @transform_4(%arg0: i32, %arg1: i32) -> (i32, i32) {
    %c0_i32 = arith.constant 0 : i32
    %c0_i32_0 = arith.constant 0 : i32
    return %c0_i32, %arg0 : i32, i32
  }
  func.func @transform_5(%arg0: i32, %arg1: i32) -> (i32, i32) {
    %c0_i32 = arith.constant 0 : i32
    %c0_i32_0 = arith.constant 0 : i32
    %c0_i32_1 = arith.constant 0 : i32
    return %c0_i32, %c0_i32_0 : i32, i32
  }
  func.func @transform_6(%arg0: i32, %arg1: i32) -> (i32, i32) {
    %c0_i32 = arith.constant 0 : i32
    %c0_i32_0 = arith.constant 0 : i32
    return %c0_i32, %arg0 : i32, i32
  }
}

</mosaic_0001>

<bundles_post_ra>
// kernel: tpu_custom_call.1
= control target key start
LH: loop header
LB: loop body
LE: loop exit
PB: predicated region body
PF: predicated region fallthrough
CT: control target
= control target key end

     0   :  { %12 = vsyncpa [#allocation5], 0  ;;  %s417_s0 = inlined_call_operand.hbm [shape: bf16[8,32], index: 0, kind: input, shape index: {}]   ;;  %s418_s1 = inlined_call_operand.hbm [shape: bf16[32,32], index: 1, kind: input, shape index: {}]   ;;  %s419_s2 = inlined_call_operand.vmem [shape: f32[1,16], index: 2, kind: input, shape index: {}]   ;;  %s420_s3 = inlined_call_operand.vmem [shape: f32[1,16], index: 3, kind: input, shape index: {}]   ;;  %s421_s4 = inlined_call_operand.vmem [shape: f32[1,16], index: 4, kind: input, shape index: {}]   ;;  %s422_s5 = inlined_call_operand.<no memory space> [shape: f32[1,1], index: 5, kind: input, shape index: {}]   ;;  %s423_s6 = inlined_call_operand.hbm [shape: f32[8,16], index: 6, kind: output, shape index: {}]  }
   0x1   :  { %13 = vsyncpa [#allocation8], 0 }
   0x2   :  { %14 = vsyncpa [#allocation6], 0  ;;  %s312_s21 = smov [#allocation4]   ;;  %s313_s23 = smov [#allocation7]  }
   0x3   :  { %s21_s22 = sshll.u32 %s312_s21, 4  ;;  %s30_s24 = sshll.u32 %s313_s23, 4  ;;  %s22_s22 = int_to_ptr.vmem [resolvable:$true] %s21_s22  ;;  %s356_s24 = int_to_ptr.vmem [resolvable:$true] %s30_s24 }
   0x4   :  { %s240_s27 = scalar_lea.hbm %s417_s0, 64 }
   0x5   :  { %p241_p0 = scmp.ne.s32.totalorder %s417_s0, %s240_s27  ;;  %p244_p1 = scmp.lt.u32.totalorder %s240_s27, %s417_s0 }
   0x7   :  { %p246_p2 = pnand %p244_p1, %p241_p0 }
   0x9   :  { %249 = shalt.err (!%p246_p2)
}
   0xa   :  { %s250_s8 = scalar_lea.vmem %s22_s22, 64  ;;  %p255_p4 = scmp.lt.s32.totalorder %s22_s22, %s22_s22 }
   0xb   :  { %p251_p3 = scmp.ne.s32.totalorder %s22_s22, %s250_s8  ;;  %p256_p5 = scmp.lt.s32.totalorder %s250_s8, %s250_s8 }
   0xd   :  { %p257_p6 = por %p256_p5, %p255_p4 }
   0xf   :  { %p258_p7 = pnand %p257_p6, %p251_p3 }
  0x11   :  { %261 = shalt.err (!%p258_p7)
}
  0x12   :  { %24 = dma.hbm_to_vmem [thread:$0]  %s417_s0, 64, %s22_s22, [#allocation5]  }
  0x13   :  { %s262_s13 = scalar_lea.hbm %s418_s1, 256 }
  0x14   :  { %p263_p8 = scmp.ne.s32.totalorder %s418_s1, %s262_s13  ;;  %p266_p9 = scmp.lt.u32.totalorder %s262_s13, %s418_s1 }
  0x16   :  { %p268_p10 = pnand %p266_p9, %p263_p8 }
  0x18   :  { %271 = shalt.err (!%p268_p10)
}
  0x19   :  { %s272_s18 = scalar_lea.vmem %s356_s24, 256  ;;  %p277_p12 = scmp.lt.s32.totalorder %s356_s24, %s356_s24 }
  0x1a   :  { %p273_p11 = scmp.ne.s32.totalorder %s356_s24, %s272_s18  ;;  %p278_p13 = scmp.lt.s32.totalorder %s272_s18, %s272_s18 }
  0x1c   :  { %p279_p0 = por %p278_p13, %p277_p12 }
  0x1e   :  { %p280_p1 = pnand %p279_p0, %p273_p11 }
  0x20   :  { %283 = shalt.err (!%p280_p1)
}
  0x21   :  { %s314_s0 = smov 64   ;;  %s315_s19 = smov 4  }
  0x22   :  { %36 = dma.hbm_to_vmem [thread:$0]  %s418_s1, 256, %s356_s24, [#allocation8], %s314_s0, %s314_s0, %s315_s19  }
  0x23   :  { %306 = dma.done.wait [#allocation5], 64  }
  0x24   :  { %307 = vsyncadd [#allocation5], 4294967232 }
  0x25   :  { %308 = dma.done.wait [#allocation8], 256  }
  0x26   :  { %309 = vsyncadd [#allocation8], 4294967040  ;;  %vm56_vm0 = vcmask 261120   ;;  %v316_v0 = vmov 0.0   ;;  %vm317_vm1 = vmmov 0   ;;  %v232_v1 = vld [vmem:[#allocation7] sm:$0xff]   ;;  %v162_v33 = vlaneseq }
  0x27   :  { %215 = vmatprep.subr.bf16.mxu0 %v316_v0  ;;  %219 = vmatprep.mubr.msk.bf16.mxu0 %vm317_vm1, %v316_v0  ;;  %57 = vst.msk [vmem:[#allocation2] sm:$0xff] %vm56_vm0, %v316_v0  ;;  %v233_v2 = vld [vmem:[#allocation7 + $0x8] sm:$0xff]   ;;  %v209_v3 = vld [vmem:[%s419_s2] ss:$0 sm:$0xff]  ;;  %s318_s1 = smov 16   ;;  %vm139_vm2 = vcmask 130048   ;;  %v175_v43 = vstv %s422_s5 }
  0x28   :  { %216 = vmatpush3.bf16.msra.mxu0 %v232_v1  ;;  %132 = vrot.lane.b32.xlu0 %v209_v3, %s318_s1  ;;  %v59_v4 = vld [vmem:[#allocation4] sm:$0xf]  ;;  %s319_s2 = smov 112   ;;  %v163_v34 = vshrl.u32 %v162_v33, 7  ;;  %v136_v36 = vld [vmem:[%s420_s3] sm:$0x1] }
  0x29   :  { %217 = vmatprep.subr.bf16.mxu0 %v316_v0  ;;  %v210_v41 = vld [vmem:[%s421_s4] ss:$0 sm:$0xff]  ;;  %s320_s3 = smov [#allocation9]  }
  0x2a   :  { %v164_v38 = vsub.s32 0, %v163_v34  ;;  %s196_s30 = sshll.u32 %s320_s3, 4  ;;  %s197_s30 = int_to_ptr.vmem [resolvable:$true] %s196_s30 }
  0x2b   :  { %s284_s4 = scalar_lea.vmem %s197_s30, 128  ;;  %p289_p3 = scmp.lt.s32.totalorder %s197_s30, %s197_s30 }
  0x2c   :  { %218 = vmatpush3.bf16.msra.mxu0 %v233_v2  ;;  %p285_p2 = scmp.ne.s32.totalorder %s197_s30, %s284_s4  ;;  %p290_p4 = scmp.lt.s32.totalorder %s284_s4, %s284_s4 }
  0x2e   :  { %v58_v5 = vld [vmem:[#allocation2] sm:$0xff]  ;;  %p291_p5 = por %p290_p4, %p289_p3 }
  0x2f   :  { %220 = vmatmul.mubr.msk.bf16.vlgmr.msra.gmra.mrb[0].mxu0 %vm56_vm0, %v59_v4 }
  0x30   :  { %p292_p6 = pnand %p291_p5, %p285_p2 }
  0x9a   :  { %v133_v11 = vpop.permute.xlu0 %132 }
 0x102   :  { %v114_v6 = vpop.f32.mrb[0].mxu0 }
 0x103   :  { %v120_v7 = vadd.f32 %v114_v6, %v58_v5  ;;  %v221_v8 = vpop.f32.mrb[1].mxu0 }
 0x104   :  { %v117_v9 = vpop.f32.mrb[2].mxu0 }
 0x105   :  { %121 = vst.msk [vmem:[#allocation2] sm:$0xff] %vm56_vm0, %v120_v7  ;;  %v222_v10 = vpop.f32.mrb[3].mxu0 }
 0x10c   :  { %v125_v12 = vld [vmem:[#allocation2] sm:$0xff] }
 0x10d   :  { %v135_v13 = vadd.f32 %v133_v11, %v125_v12  ;;  %v140_v14 = vsel %vm139_vm2, %v125_v12, 0.0 }
 0x10e   :  { %v141_v15 = vrot.slane %v140_v14, 4 }
 0x10f   :  { %185 = vrot.lane.b32.xlu0 %v135_v13, %s319_s2 }
 0x110   :  { %v142_v16 = vadd.f32 %v141_v15, %v140_v14 }
 0x112   :  { %v143_v17 = vrot.slane %v142_v16, 2 }
 0x114   :  { %v144_v18 = vadd.f32 %v143_v17, %v142_v16 }
 0x116   :  { %v145_v19 = vrot.slane %v144_v18, 1 }
 0x118   :  { %v146_v20 = vadd.f32 %v145_v19, %v144_v18 }
 0x11a   :  { %v147_v21 = vmul.f32 0.125, %v146_v20 }
 0x11c   :  { %v148_v22 = vsub.f32 %v125_v12, %v147_v21 }
 0x11e   :  { %v149_v23 = vmul.f32 %v148_v22, %v148_v22 }
 0x120   :  { %v150_v24 = vsel %vm139_vm2, %v149_v23, 0.0 }
 0x121   :  { %v151_v25 = vrot.slane %v150_v24, 4 }
 0x123   :  { %v152_v26 = vadd.f32 %v151_v25, %v150_v24 }
 0x125   :  { %v153_v27 = vrot.slane %v152_v26, 2 }
 0x127   :  { %v154_v28 = vadd.f32 %v153_v27, %v152_v26 }
 0x129   :  { %v155_v29 = vrot.slane %v154_v28, 1 }
 0x12b   :  { %v156_v30 = vadd.f32 %v155_v29, %v154_v28 }
 0x12d   :  { %v157_v31 = vmul.f32 0.125, %v156_v30 }
 0x12f   :  { %v158_v32 = vadd.f32 1e-05, %v157_v31 }
 0x131   :  { %234 = vrsqrt.f32 %v158_v32 }
 0x13b   :  { %v235_v35 = vpop.eup %234 }
 0x13c   :  { %v160_v37 = vmul.f32 %v235_v35, %v136_v36 }
 0x13e   :  { %v165_v39 = vrot.slane %v160_v37, %v164_v38 }
 0x140   :  { %v167_v40 = vmul.f32 %v165_v39, %v148_v22 }
 0x142   :  { %v174_v42 = vadd.f32 %v210_v41, %v167_v40 }
 0x144   :  { %v176_v44 = vmul.f32 %v175_v43, %v174_v42 }
 0x146   :  { %v211_v45 = vmul.f32 -1.442695, %v176_v44 }
 0x148   :  { %236 = vpow2.f32 %v211_v45 }
 0x152   :  { %v237_v46 = vpop.eup %236 }
 0x153   :  { %v180_v47 = vadd.f32 1.0, %v237_v46 }
 0x155   :  { %238 = vrcp.f32 %v180_v47 }
 0x15f   :  { %v239_v48 = vpop.eup %238 }
 0x160   :  { %v183_v49 = vmul.f32 %v239_v48, %v174_v42 }
 0x181   :  { %v186_v50 = vpop.permute.xlu0 %185 }
 0x182   :  { %v188_v51 = vadd.f32 %v186_v50, %v183_v49 }
 0x184   :  { %189 = vst.msk [vmem:[#allocation9] sm:$0xff] %vm139_vm2, %v188_v51 }
 0x185   :  { %295 = shalt.err (!%p292_p6)
}
 0x186   :  { %s296_s8 = scalar_lea.hbm %s423_s6, 128 }
 0x187   :  { %p297_p7 = scmp.ne.s32.totalorder %s423_s6, %s296_s8  ;;  %p300_p8 = scmp.lt.u32.totalorder %s296_s8, %s423_s6 }
 0x189   :  { %p302_p9 = pnand %p300_p8, %p297_p7 }
 0x18b   :  { %305 = shalt.err (!%p302_p9)
}
 0x18c   :  { %199 = dma.vmem_to_hbm [thread:$0]  %s197_s30, 128, %s423_s6, [#allocation6]  }
 0x18d   :  { %310 = dma.done.wait [#allocation6], 128  }
 0x18e   :  { %311 = vsyncadd [#allocation6], 4294967168 }
 0x18f   :  { %203 = vsyncpa [#allocation5], 1 }
 0x190   :  { %204 = vsyncpa [#allocation8], 1 }
 0x191   :  { %205 = vsyncpa [#allocation6], 1 }

</bundles_post_ra>
